<compile_context>
chip_gen: v7x
topology: tpu7x:2x2x1
jax: 0.10.0
libtpu: 0.0.40
codegen_flags: <defaults>
</compile_context>

<pallas_src>
import jax
import jax.numpy as jnp
from jax.experimental import pallas as pl
from jax.experimental.pallas import tpu as pltpu


def vae_kernel(
    x_ref, eps_ref,
    w1_ref, b1_ref,        # encoder trunk   (bf16 W, f32 b)
    w2_ref, b2_ref,        # fused mu|logvar head (HID, 2L)
    w3_ref, b3_ref,        # decoder trunk
    w4_ref, b4_ref,        # decoder output
    xrec_ref, mu_ref, std_ref,
):
    """One batch tile of the fused VAE forward. Weights are VMEM-resident."""
    x = x_ref[...]            # (TB, D) f32
    eps = eps_ref[...]        # (TB, L) f32
    L = mu_ref.shape[-1]

    # ---- Encoder trunk: bf16 operands on MXU, f32 accumulate, f32 epilogue ----
    h = jnp.dot(x.astype(jnp.bfloat16), w1_ref[...],
                preferred_element_type=jnp.float32) + b1_ref[...]
    h = jnp.maximum(h, 0.0)                                   # ReLU (f32 VPU)

    # ---- Fused stats head: single (HID, 2L) dot, static lane-slice split ----
    stats = jnp.dot(h.astype(jnp.bfloat16), w2_ref[...],
                    preferred_element_type=jnp.float32) + b2_ref[...]
    mu = stats[:, :L]                                         # (TB, L)
    logvar = stats[:, L:]                                     # (TB, L)
    std = jnp.exp(0.5 * logvar)                               # f32 EUP
    # (logvar is intentionally NOT clamped to match the reference semantics.)

    # ---- rsample (reparameterization trick) ----
    z = mu + std * eps                                        # (TB, L) f32

    # ---- Decoder ----
    h2 = jnp.dot(z.astype(jnp.bfloat16), w3_ref[...],
                 preferred_element_type=jnp.float32) + b3_ref[...]
    h2 = jnp.maximum(h2, 0.0)
    xrec = jnp.dot(h2.astype(jnp.bfloat16), w4_ref[...],
                   preferred_element_type=jnp.float32) + b4_ref[...]

    # ---- Direct stores (no packing / concatenation) ----
    xrec_ref[...] = xrec
    mu_ref[...] = mu
    std_ref[...] = std


def _round_up(n, m):
    return ((n + m - 1) // m) * m


def vae_forward(x_nchw, eps, params, *, tb=None):
    """Returns (x_reconstructed [B,C,H,W], (mu, std)) — Normal dist as a tuple.

    `params` = (w1, b1, w2, b2, w3, b3, w4, b4) with weight matrices already
    cast to bf16 (see prepare_params). The batch is tiled over a 1-D grid;
    weights use constant index_maps so they are loaded once and reused.
    """
    B, C, H, W = x_nchw.shape
    D = C * H * W
    L = eps.shape[1]
    x = x_nchw.reshape(B, D)

    # Batch tile: at least one full sublane group (8), at most 128 rows/step.
    if tb is None:
        tb = min(128, _round_up(B, 8))
    b_pad = _round_up(B, tb)
    if b_pad != B:
        x = jnp.pad(x, ((0, b_pad - B), (0, 0)))
        eps = jnp.pad(eps, ((0, b_pad - B), (0, 0)))

    w1, b1, w2, b2, w3, b3, w4, b4 = params

    def batch_spec(n):
        return pl.BlockSpec((tb, n), lambda i: (i, 0))

    def const_spec(arr):
        return pl.BlockSpec(arr.shape, lambda i: (0, 0))

    out_shapes = (
        jax.ShapeDtypeStruct((b_pad, D), jnp.float32),   # reconstruction (flat)
        jax.ShapeDtypeStruct((b_pad, L), jnp.float32),   # mu
        jax.ShapeDtypeStruct((b_pad, L), jnp.float32),   # std
    )

    xrec_flat, mu, std = pl.pallas_call(
        vae_kernel,
        out_shape=out_shapes,
        grid_spec=pltpu.PrefetchScalarGridSpec(
            num_scalar_prefetch=0,
            grid=(b_pad // tb,),
            in_specs=[
                batch_spec(D),            # x
                batch_spec(L),            # eps
                const_spec(w1), const_spec(b1),
                const_spec(w2), const_spec(b2),
                const_spec(w3), const_spec(b3),
                const_spec(w4), const_spec(b4),
            ],
            out_specs=(batch_spec(D), batch_spec(L), batch_spec(L)),
        ),
        compiler_params=pltpu.CompilerParams(
            dimension_semantics=("parallel",)),
    )(x, eps, w1, b1, w2, b2, w3, b3, w4, b4)

    x_reconstructed = xrec_flat[:B].reshape(B, C, H, W)
    return x_reconstructed, (mu[:B], std[:B])


def prepare_params(w1, b1, w2, b2, w3, b3, w4, b4):
    """Cast weight matrices to bf16 (biases stay f32, kept as (1, N) rows)."""
    bf = jnp.bfloat16
    # TODO(synk): fp8 (e4m3) + per-column f32 scales on v7x, int8 + scales on
    #             v5e/v6e, once accuracy requirements are known.
    return (w1.astype(bf), b1, w2.astype(bf), b2,
            w3.astype(bf), b3, w4.astype(bf), b4)


def _reference_forward(x_nchw, eps, params):
    """Plain-JAX reference using the SAME bf16 weights / f32 accumulation."""
    w1, b1, w2, b2, w3, b3, w4, b4 = params
    bf = jnp.bfloat16
    B = x_nchw.shape[0]
    L = eps.shape[1]
    x = x_nchw.reshape(B, -1)
    h = jnp.maximum(
        jnp.dot(x.astype(bf), w1, preferred_element_type=jnp.float32) + b1, 0.0)
    stats = jnp.dot(h.astype(bf), w2, preferred_element_type=jnp.float32) + b2
    mu, logvar = stats[:, :L], stats[:, L:]
    std = jnp.exp(0.5 * logvar)
    z = mu + std * eps
    h2 = jnp.maximum(
        jnp.dot(z.astype(bf), w3, preferred_element_type=jnp.float32) + b3, 0.0)
    xrec = jnp.dot(h2.astype(bf), w4, preferred_element_type=jnp.float32) + b4
    return xrec.reshape(x_nchw.shape), mu, std


if __name__ == "__main__":
    # Small shapes consistent with an NCHW VAE input.
    B, C, Himg, Wimg = 2, 4, 16, 16
    D = C * Himg * Wimg          # 1024
    HID = 128                    # hidden width
    LAT = 32                     # latent dim

    key = jax.random.PRNGKey(0)
    kx, keps, k1, k2, k3, k4 = jax.random.split(key, 6)

    x = jax.random.normal(kx, (B, C, Himg, Wimg), dtype=jnp.float32)
    eps = jax.random.normal(keps, (B, LAT), dtype=jnp.float32)   # rsample noise

    # Deterministic parameter init. Biases kept 2-D (1, N) for clean VMEM layout.
    w1 = jax.random.normal(k1, (D, HID), dtype=jnp.float32) * 0.02
    b1 = jnp.zeros((1, HID), dtype=jnp.float32)
    w2 = jax.random.normal(k2, (HID, 2 * LAT), dtype=jnp.float32) * 0.02
    b2 = jnp.zeros((1, 2 * LAT), dtype=jnp.float32)
    w3 = jax.random.normal(k3, (LAT, HID), dtype=jnp.float32) * 0.02
    b3 = jnp.zeros((1, HID), dtype=jnp.float32)
    w4 = jax.random.normal(k4, (HID, D), dtype=jnp.float32) * 0.02
    b4 = jnp.zeros((1, D), dtype=jnp.float32)

    params = prepare_params(w1, b1, w2, b2, w3, b3, w4, b4)

    x_rec, (mu, std) = vae_forward(x, eps, params)
    x_rec = jax.block_until_ready(x_rec)
    mu = jax.block_until_ready(mu)
    std = jax.block_until_ready(std)

    # Sanity check vs plain-JAX reference (same bf16 weights, f32 accumulate).
    xr_ref, mu_ref, std_ref = _reference_forward(x, eps, params)
    assert x_rec.shape == (B, C, Himg, Wimg)
    assert mu.shape == (B, LAT) and std.shape == (B, LAT)
    assert jnp.allclose(x_rec, xr_ref, atol=1e-2, rtol=1e-2)
    assert jnp.allclose(mu, mu_ref, atol=1e-2, rtol=1e-2)
    assert jnp.allclose(std, std_ref, atol=1e-2, rtol=1e-2)

    print("KERNEL_OK")
</pallas_src>

<mosaic_0001>
module attributes {stable_mosaic.version = 11 : i64} {
  func.func @vae_kernel(%arg0: i32, %arg1: memref<8x1024xf32, #tpu.memory_space<vmem>>, %arg2: memref<8x32xf32, #tpu.memory_space<vmem>>, %arg3: memref<1024x128xbf16, #tpu.memory_space<vmem>>, %arg4: memref<1x128xf32, #tpu.memory_space<vmem>>, %arg5: memref<128x64xbf16, #tpu.memory_space<vmem>>, %arg6: memref<1x64xf32, #tpu.memory_space<vmem>>, %arg7: memref<32x128xbf16, #tpu.memory_space<vmem>>, %arg8: memref<1x128xf32, #tpu.memory_space<vmem>>, %arg9: memref<128x1024xbf16, #tpu.memory_space<vmem>>, %arg10: memref<1x1024xf32, #tpu.memory_space<vmem>>, %arg11: memref<8x1024xf32, #tpu.memory_space<vmem>>, %arg12: memref<8x32xf32, #tpu.memory_space<vmem>>, %arg13: memref<8x32xf32, #tpu.memory_space<vmem>>) attributes {dimension_semantics = [#tpu.dimension_semantics<parallel>], iteration_bounds = array<i64: 1>, scalar_prefetch = 0 : i64, scratch_operands = 0 : i64, tpu.core_type = #tpu.core_type<tc>, window_params = [{transform_indices = @transform_0, window_bounds = array<i64: 8, 1024>}, {transform_indices = @transform_1, window_bounds = array<i64: 8, 32>}, {pipeline_mode = #tpu.pipeline_mode<synchronous>, transform_indices = @transform_2, window_bounds = array<i64: 1024, 128>}, {pipeline_mode = #tpu.pipeline_mode<synchronous>, transform_indices = @transform_3, window_bounds = array<i64: 1, 128>}, {pipeline_mode = #tpu.pipeline_mode<synchronous>, transform_indices = @transform_4, window_bounds = array<i64: 128, 64>}, {pipeline_mode = #tpu.pipeline_mode<synchronous>, transform_indices = @transform_5, window_bounds = array<i64: 1, 64>}, {pipeline_mode = #tpu.pipeline_mode<synchronous>, transform_indices = @transform_6, window_bounds = array<i64: 32, 128>}, {pipeline_mode = #tpu.pipeline_mode<synchronous>, transform_indices = @transform_7, window_bounds = array<i64: 1, 128>}, {pipeline_mode = #tpu.pipeline_mode<synchronous>, transform_indices = @transform_8, window_bounds = array<i64: 128, 1024>}, {pipeline_mode = #tpu.pipeline_mode<synchronous>, transform_indices = @transform_9, window_bounds = array<i64: 1, 1024>}, {transform_indices = @transform_10, window_bounds = array<i64: 8, 1024>}, {transform_indices = @transform_11, window_bounds = array<i64: 8, 32>}, {transform_indices = @transform_12, window_bounds = array<i64: 8, 32>}]} {
    %c0 = arith.constant 0 : index
    %c0_0 = arith.constant 0 : index
    %0 = vector.load %arg1[%c0, %c0_0] : memref<8x1024xf32, #tpu.memory_space<vmem>>, vector<8x1024xf32>
    %c0_1 = arith.constant 0 : index
    %c0_2 = arith.constant 0 : index
    %1 = vector.load %arg2[%c0_1, %c0_2] : memref<8x32xf32, #tpu.memory_space<vmem>>, vector<8x32xf32>
    %2 = arith.truncf %0 : vector<8x1024xf32> to vector<8x1024xbf16>
    %c0_3 = arith.constant 0 : index
    %c0_4 = arith.constant 0 : index
    %3 = vector.load %arg3[%c0_3, %c0_4] : memref<1024x128xbf16, #tpu.memory_space<vmem>>, vector<1024x128xbf16>
    %cst = arith.constant dense<0.000000e+00> : vector<8x128xf32>
    %4 = tpu.matmul %2, %3, %cst {dimension_numbers = #tpu.dot_dimension_numbers<[1], [0], [0], [1], [0, 0, 1, 1], [], []>} : vector<8x1024xbf16>, vector<1024x128xbf16>, vector<8x128xf32> -> vector<8x128xf32>
    %c0_5 = arith.constant 0 : index
    %c0_6 = arith.constant 0 : index
    %5 = vector.load %arg4[%c0_5, %c0_6] : memref<1x128xf32, #tpu.memory_space<vmem>>, vector<1x128xf32>
    %6 = vector.broadcast %5 : vector<1x128xf32> to vector<8x128xf32>
    %7 = arith.addf %4, %6 : vector<8x128xf32>
    %cst_7 = arith.constant 0.000000e+00 : f32
    %8 = vector.broadcast %cst_7 : f32 to vector<8x128xf32>
    %9 = arith.maximumf %7, %8 : vector<8x128xf32>
    %10 = arith.truncf %9 : vector<8x128xf32> to vector<8x128xbf16>
    %c0_8 = arith.constant 0 : index
    %c0_9 = arith.constant 0 : index
    %11 = vector.load %arg5[%c0_8, %c0_9] : memref<128x64xbf16, #tpu.memory_space<vmem>>, vector<128x64xbf16>
    %cst_10 = arith.constant dense<0.000000e+00> : vector<8x64xf32>
    %12 = tpu.matmul %10, %11, %cst_10 {dimension_numbers = #tpu.dot_dimension_numbers<[1], [0], [0], [1], [0, 0, 1, 1], [], []>} : vector<8x128xbf16>, vector<128x64xbf16>, vector<8x64xf32> -> vector<8x64xf32>
    %c0_11 = arith.constant 0 : index
    %c0_12 = arith.constant 0 : index
    %13 = vector.load %arg6[%c0_11, %c0_12] : memref<1x64xf32, #tpu.memory_space<vmem>>, vector<1x64xf32>
    %14 = vector.broadcast %13 : vector<1x64xf32> to vector<8x64xf32>
    %15 = arith.addf %12, %14 : vector<8x64xf32>
    %16 = vector.extract_strided_slice %15 {offsets = [0, 0], sizes = [8, 32], strides = [1, 1]} : vector<8x64xf32> to vector<8x32xf32>
    %17 = vector.extract_strided_slice %15 {offsets = [0, 32], sizes = [8, 32], strides = [1, 1]} : vector<8x64xf32> to vector<8x32xf32>
    %cst_13 = arith.constant 5.000000e-01 : f32
    %18 = vector.broadcast %cst_13 : f32 to vector<8x32xf32>
    %19 = arith.mulf %18, %17 : vector<8x32xf32>
    %20 = math.exp %19 : vector<8x32xf32>
    %21 = arith.mulf %20, %1 : vector<8x32xf32>
    %22 = arith.addf %16, %21 : vector<8x32xf32>
    %23 = arith.truncf %22 : vector<8x32xf32> to vector<8x32xbf16>
    %c0_14 = arith.constant 0 : index
    %c0_15 = arith.constant 0 : index
    %24 = vector.load %arg7[%c0_14, %c0_15] : memref<32x128xbf16, #tpu.memory_space<vmem>>, vector<32x128xbf16>
    %cst_16 = arith.constant dense<0.000000e+00> : vector<8x128xf32>
    %25 = tpu.matmul %23, %24, %cst_16 {dimension_numbers = #tpu.dot_dimension_numbers<[1], [0], [0], [1], [0, 0, 1, 1], [], []>} : vector<8x32xbf16>, vector<32x128xbf16>, vector<8x128xf32> -> vector<8x128xf32>
    %c0_17 = arith.constant 0 : index
    %c0_18 = arith.constant 0 : index
    %26 = vector.load %arg8[%c0_17, %c0_18] : memref<1x128xf32, #tpu.memory_space<vmem>>, vector<1x128xf32>
    %27 = vector.broadcast %26 : vector<1x128xf32> to vector<8x128xf32>
    %28 = arith.addf %25, %27 : vector<8x128xf32>
    %cst_19 = arith.constant 0.000000e+00 : f32
    %29 = vector.broadcast %cst_19 : f32 to vector<8x128xf32>
    %30 = arith.maximumf %28, %29 : vector<8x128xf32>
    %31 = arith.truncf %30 : vector<8x128xf32> to vector<8x128xbf16>
    %c0_20 = arith.constant 0 : index
    %c0_21 = arith.constant 0 : index
    %32 = vector.load %arg9[%c0_20, %c0_21] : memref<128x1024xbf16, #tpu.memory_space<vmem>>, vector<128x1024xbf16>
    %cst_22 = arith.constant dense<0.000000e+00> : vector<8x1024xf32>
    %33 = tpu.matmul %31, %32, %cst_22 {dimension_numbers = #tpu.dot_dimension_numbers<[1], [0], [0], [1], [0, 0, 1, 1], [], []>} : vector<8x128xbf16>, vector<128x1024xbf16>, vector<8x1024xf32> -> vector<8x1024xf32>
    %c0_23 = arith.constant 0 : index
    %c0_24 = arith.constant 0 : index
    %34 = vector.load %arg10[%c0_23, %c0_24] : memref<1x1024xf32, #tpu.memory_space<vmem>>, vector<1x1024xf32>
    %35 = vector.broadcast %34 : vector<1x1024xf32> to vector<8x1024xf32>
    %36 = arith.addf %33, %35 : vector<8x1024xf32>
    %c0_25 = arith.constant 0 : index
    %c0_26 = arith.constant 0 : index
    %37 = vector.load %arg11[%c0_25, %c0_26] : memref<8x1024xf32, #tpu.memory_space<vmem>>, vector<8x1024xf32>
    tpu.vector_store %arg11[%c0_25, %c0_26], %36 {strides = array<i32>} : memref<8x1024xf32, #tpu.memory_space<vmem>>, vector<8x1024xf32>,
    %c0_27 = arith.constant 0 : index
    %c0_28 = arith.constant 0 : index
    %38 = vector.load %arg12[%c0_27, %c0_28] : memref<8x32xf32, #tpu.memory_space<vmem>>, vector<8x32xf32>
    tpu.vector_store %arg12[%c0_27, %c0_28], %16 {strides = array<i32>} : memref<8x32xf32, #tpu.memory_space<vmem>>, vector<8x32xf32>,
    %c0_29 = arith.constant 0 : index
    %c0_30 = arith.constant 0 : index
    %39 = vector.load %arg13[%c0_29, %c0_30] : memref<8x32xf32, #tpu.memory_space<vmem>>, vector<8x32xf32>
    tpu.vector_store %arg13[%c0_29, %c0_30], %20 {strides = array<i32>} : memref<8x32xf32, #tpu.memory_space<vmem>>, vector<8x32xf32>,
    return
  }
  func.func @transform_0(%arg0: i32) -> (i32, i32) {
    %c0_i32 = arith.constant 0 : i32
    %c0_i32_0 = arith.constant 0 : i32
    return %arg0, %c0_i32 : i32, i32
  }
  func.func @transform_1(%arg0: i32) -> (i32, i32) {
    %c0_i32 = arith.constant 0 : i32
    %c0_i32_0 = arith.constant 0 : i32
    return %arg0, %c0_i32 : i32, i32
  }
  func.func @transform_2(%arg0: i32) -> (i32, i32) {
    %c0_i32 = arith.constant 0 : i32
    %c0_i32_0 = arith.constant 0 : i32
    %c0_i32_1 = arith.constant 0 : i32
    return %c0_i32, %c0_i32_0 : i32, i32
  }
  func.func @transform_3(%arg0: i32) -> (i32, i32) {
    %c0_i32 = arith.constant 0 : i32
    %c0_i32_0 = arith.constant 0 : i32
    %c0_i32_1 = arith.constant 0 : i32
    return %c0_i32, %c0_i32_0 : i32, i32
  }
  func.func @transform_4(%arg0: i32) -> (i32, i32) {
    %c0_i32 = arith.constant 0 : i32
    %c0_i32_0 = arith.constant 0 : i32
    %c0_i32_1 = arith.constant 0 : i32
    return %c0_i32, %c0_i32_0 : i32, i32
  }
  func.func @transform_5(%arg0: i32) -> (i32, i32) {
    %c0_i32 = arith.constant 0 : i32
    %c0_i32_0 = arith.constant 0 : i32
    %c0_i32_1 = arith.constant 0 : i32
    return %c0_i32, %c0_i32_0 : i32, i32
  }
  func.func @transform_6(%arg0: i32) -> (i32, i32) {
    %c0_i32 = arith.constant 0 : i32
    %c0_i32_0 = arith.constant 0 : i32
    %c0_i32_1 = arith.constant 0 : i32
    return %c0_i32, %c0_i32_0 : i32, i32
  }
  func.func @transform_7(%arg0: i32) -> (i32, i32) {
    %c0_i32 = arith.constant 0 : i32
    %c0_i32_0 = arith.constant 0 : i32
    %c0_i32_1 = arith.constant 0 : i32
    return %c0_i32, %c0_i32_0 : i32, i32
  }
  func.func @transform_8(%arg0: i32) -> (i32, i32) {
    %c0_i32 = arith.constant 0 : i32
    %c0_i32_0 = arith.constant 0 : i32
    %c0_i32_1 = arith.constant 0 : i32
    return %c0_i32, %c0_i32_0 : i32, i32
  }
  func.func @transform_9(%arg0: i32) -> (i32, i32) {
    %c0_i32 = arith.constant 0 : i32
    %c0_i32_0 = arith.constant 0 : i32
    %c0_i32_1 = arith.constant 0 : i32
    return %c0_i32, %c0_i32_0 : i32, i32
  }
  func.func @transform_10(%arg0: i32) -> (i32, i32) {
    %c0_i32 = arith.constant 0 : i32
    %c0_i32_0 = arith.constant 0 : i32
    return %arg0, %c0_i32 : i32, i32
  }
  func.func @transform_11(%arg0: i32) -> (i32, i32) {
    %c0_i32 = arith.constant 0 : i32
    %c0_i32_0 = arith.constant 0 : i32
    return %arg0, %c0_i32 : i32, i32
  }
  func.func @transform_12(%arg0: i32) -> (i32, i32) {
    %c0_i32 = arith.constant 0 : i32
    %c0_i32_0 = arith.constant 0 : i32
    return %arg0, %c0_i32 : i32, i32
  }
}

</mosaic_0001>

<bundles_post_ra>
// kernel: tpu_custom_call.1
= control target key start
LH: loop header
LB: loop body
LE: loop exit
PB: predicated region body
PF: predicated region fallthrough
CT: control target
= control target key end

     0   :  { %18 = vsyncpa [#allocation3], 0  ;;  %s2316_s0 = inlined_call_operand.vmem [shape: f32[8,1024], index: 0, kind: input, shape index: {}]   ;;  %s2317_s1 = inlined_call_operand.vmem [shape: f32[8,32], index: 1, kind: input, shape index: {}]   ;;  %s2318_s2 = inlined_call_operand.hbm [shape: bf16[1024,128], index: 2, kind: input, shape index: {}]   ;;  %s2319_s3 = inlined_call_operand.vmem [shape: f32[1,128], index: 3, kind: input, shape index: {}]   ;;  %s2320_s4 = inlined_call_operand.vmem [shape: bf16[128,64], index: 4, kind: input, shape index: {}]   ;;  %s2321_s5 = inlined_call_operand.vmem [shape: f32[1,64], index: 5, kind: input, shape index: {}]   ;;  %s2322_s6 = inlined_call_operand.vmem [shape: bf16[32,128], index: 6, kind: input, shape index: {}]   ;;  %s2323_s7 = inlined_call_operand.vmem [shape: f32[1,128], index: 7, kind: input, shape index: {}]   ;;  %s2324_s8 = inlined_call_operand.hbm [shape: bf16[128,1024], index: 8, kind: input, shape index: {}]   ;;  %s2325_s9 = inlined_call_operand.vmem [shape: f32[1,1024], index: 9, kind: input, shape index: {}]   ;;  %s2326_s10 = inlined_call_operand.hbm [shape: f32[8,1024], index: 10, kind: output, shape index: {0}]   ;;  %s2327_s11 = inlined_call_operand.hbm [shape: f32[8,32], index: 11, kind: output, shape index: {1}]   ;;  %s2328_s12 = inlined_call_operand.hbm [shape: f32[8,32], index: 12, kind: output, shape index: {2}]  }
   0x1   :  { %19 = vsyncpa [#allocation6], 0 }
   0x2   :  { %20 = vsyncpa [#allocation4], 0 }
   0x3   :  { %21 = vsyncpa [#allocation9], 0  ;;  %s2085_s21 = smov [#allocation2]   ;;  %s1967_s25 = scalar_lea.hbm %s2318_s2, 8192 }
   0x4   :  { %s31_s22 = sshll.u32 %s2085_s21, 4  ;;  %p1968_p0 = scmp.ne.s32.totalorder %s2318_s2, %s1967_s25  ;;  %s32_s22 = int_to_ptr.vmem [resolvable:$true] %s31_s22 }
   0x5   :  { %p1971_p1 = scmp.lt.u32.totalorder %s1967_s25, %s2318_s2 }
   0x7   :  { %p1973_p2 = pnand %p1971_p1, %p1968_p0 }
   0x9   :  { %1976 = shalt.err (!%p1973_p2)
}
   0xa   :  { %s1977_s30 = scalar_lea.vmem %s32_s22, 8192  ;;  %p1982_p4 = scmp.lt.s32.totalorder %s32_s22, %s32_s22 }
   0xb   :  { %p1978_p3 = scmp.ne.s32.totalorder %s32_s22, %s1977_s30  ;;  %p1983_p5 = scmp.lt.s32.totalorder %s1977_s30, %s1977_s30 }
   0xd   :  { %p1984_p6 = por %p1983_p5, %p1982_p4 }
   0xf   :  { %p1985_p7 = pnand %p1984_p6, %p1978_p3 }
  0x11   :  { %1988 = shalt.err (!%p1985_p7)
}
  0x12   :  { %s2086_s13 = smov 64   ;;  %s2087_s14 = smov 4  }
  0x13   :  { %37 = dma.hbm_to_vmem [thread:$0]  %s2318_s2, 8192, %s32_s22, [#allocation3], %s2086_s13, %s2086_s13, %s2087_s14  }
  0x14   :  { %s2088_s17 = smov [#allocation5]   ;;  %s1989_s21 = scalar_lea.hbm %s2324_s8, 8192 }
  0x15   :  { %s53_s18 = sshll.u32 %s2088_s17, 4  ;;  %p1990_p8 = scmp.ne.s32.totalorder %s2324_s8, %s1989_s21  ;;  %s54_s18 = int_to_ptr.vmem [resolvable:$true] %s53_s18 }
  0x16   :  { %p1993_p9 = scmp.lt.u32.totalorder %s1989_s21, %s2324_s8 }
  0x18   :  { %p1995_p10 = pnand %p1993_p9, %p1990_p8 }
  0x1a   :  { %1998 = shalt.err (!%p1995_p10)
}
  0x1b   :  { %s1999_s27 = scalar_lea.vmem %s54_s18, 8192  ;;  %p2004_p12 = scmp.lt.s32.totalorder %s54_s18, %s54_s18 }
  0x1c   :  { %p2000_p11 = scmp.ne.s32.totalorder %s54_s18, %s1999_s27  ;;  %p2005_p13 = scmp.lt.s32.totalorder %s1999_s27, %s1999_s27 }
  0x1e   :  { %p2006_p0 = por %p2005_p13, %p2004_p12 }
  0x20   :  { %p2007_p1 = pnand %p2006_p0, %p2000_p11 }
  0x22   :  { %2010 = shalt.err (!%p2007_p1)
}
  0x23   :  { %s2089_s2 = smov 512   ;;  %s2090_s22 = smov 32  }
  0x24   :  { %59 = dma.hbm_to_vmem [thread:$0]  %s2324_s8, 8192, %s54_s18, [#allocation6], %s2089_s2, %s2089_s2, %s2090_s22  }
  0x25   :  { %2077 = dma.done.wait [#allocation3], 8192  }
  0x26   :  { %2078 = vsyncadd [#allocation3], 4294959104 }
  0x27   :  { %2079 = dma.done.wait [#allocation6], 8192  }
  0x28   :  { %2080 = vsyncadd [#allocation6], 4294959104  ;;  %v1891_v0 = vld [vmem:[#allocation2 + $0x40] sm:$0xff]   ;;  %v1895_v4 = vld [vmem:[#allocation2 + $0x48] sm:$0xff]   ;;  %vm2092_vm0 = vmmov 0   ;;  %vm915_vm1 = vcmask 261120  }
  0x29   :  { %v1892_v1 = vld [vmem:[#allocation2 + $0xc0] sm:$0xff]   ;;  %1750 = vmatprep.subr.bf16.mxu0 %v1891_v0  ;;  %v1896_v5 = vld [vmem:[#allocation2 + $0xc8] sm:$0xff]   ;;  %v1899_v8 = vld [vmem:[#allocation2 + $0x50] sm:$0xff]  }
  0x2a   :  { %v1893_v2 = vld [vmem:[#allocation2] sm:$0xff]   ;;  %1772 = vmatprep.subr.bf16.mxu1 %v1892_v1  ;;  %v1897_v6 = vld [vmem:[#allocation2 + $0x8] sm:$0xff]   ;;  %v1900_v9 = vld [vmem:[#allocation2 + $0xd0] sm:$0xff]  }
  0x2b   :  { %v1894_v3 = vld [vmem:[#allocation2 + $0x80] sm:$0xff]   ;;  %1751 = vmatpush3.bf16.msra.mxu0 %v1893_v2  ;;  %v1898_v7 = vld [vmem:[#allocation2 + $0x88] sm:$0xff]   ;;  %v1901_v10 = vld [vmem:[#allocation2 + $0x10] sm:$0xff]  }
  0x2c   :  { %1773 = vmatpush3.bf16.msra.mxu1 %v1894_v3  ;;  %1752 = vmatprep.subr.bf16.mxu0 %v1895_v4  ;;  %v1902_v11 = vld [vmem:[#allocation2 + $0x90] sm:$0xff]   ;;  %v1903_v12 = vld [vmem:[#allocation2 + $0x58] sm:$0xff]   ;;  %v1907_v16 = vld [vmem:[#allocation2 + $0x60] sm:$0xff]  }
  0x2d   :  { %1774 = vmatprep.subr.bf16.mxu1 %v1896_v5  ;;  %v1904_v13 = vld [vmem:[#allocation2 + $0xd8] sm:$0xff]   ;;  %v1908_v17 = vld [vmem:[#allocation2 + $0xe0] sm:$0xff]   ;;  %v1911_v20 = vld [vmem:[#allocation2 + $0x68] sm:$0xff]  }
  0x2e   :  { %v1905_v14 = vld [vmem:[#allocation2 + $0x18] sm:$0xff]   ;;  %v1909_v18 = vld [vmem:[#allocation2 + $0x20] sm:$0xff]   ;;  %v1912_v21 = vld [vmem:[#allocation2 + $0xe8] sm:$0xff]  }
  0x2f   :  { %1753 = vmatpush3.bf16.msra.mxu0 %v1897_v6  ;;  %v1906_v15 = vld [vmem:[#allocation2 + $0x98] sm:$0xff]   ;;  %v1910_v19 = vld [vmem:[#allocation2 + $0xa0] sm:$0xff]   ;;  %v1913_v22 = vld [vmem:[#allocation2 + $0x28] sm:$0xff]  }
  0x30   :  { %1775 = vmatpush3.bf16.msra.mxu1 %v1898_v7  ;;  %1754 = vmatprep.subr.bf16.mxu0 %v1899_v8  ;;  %v1914_v23 = vld [vmem:[#allocation2 + $0xa8] sm:$0xff]   ;;  %v1915_v24 = vld [vmem:[#allocation2 + $0x70] sm:$0xff]   ;;  %v1919_v28 = vld [vmem:[#allocation2 + $0x78] sm:$0xff]  }
  0x31   :  { %1776 = vmatprep.subr.bf16.mxu1 %v1900_v9  ;;  %v1916_v25 = vld [vmem:[#allocation2 + $0xf0] sm:$0xff]   ;;  %v1920_v29 = vld [vmem:[#allocation2 + $0xf8] sm:$0xff]   ;;  %v70_v32 = vld [vmem:[%s2316_s0 + $0x8] sm:$0xff] }
  0x32   :  { %v1917_v26 = vld [vmem:[#allocation2 + $0x30] sm:$0xff]   ;;  %v1921_v30 = vld [vmem:[#allocation2 + $0x38] sm:$0xff]   ;;  %v69_v34 = vld [vmem:[%s2316_s0] sm:$0xff]  ;;  %v79_v35 = vpack.c.bf16 %v70_v32, %v70_v32 }
  0x33   :  { %1755 = vmatpush3.bf16.msra.mxu0 %v1901_v10  ;;  %v1918_v27 = vld [vmem:[#allocation2 + $0xb0] sm:$0xff]   ;;  %v1922_v31 = vld [vmem:[#allocation2 + $0xb8] sm:$0xff]   ;;  %v78_v37 = vpack.c.bf16 %v69_v34, %v69_v34  ;;  %v1923_v40 = vld [vmem:[#allocation2 + $0x140] sm:$0xff]  }
  0x34   :  { %1777 = vmatpush3.bf16.msra.mxu1 %v1902_v11  ;;  %1756 = vmatprep.subr.bf16.mxu0 %v1903_v12  ;;  %v72_v33 = vld [vmem:[%s2316_s0 + $0x18] sm:$0xff]  ;;  %v71_v38 = vld [vmem:[%s2316_s0 + $0x10] sm:$0xff]  ;;  %v1924_v41 = vld [vmem:[#allocation2 + $0x1c0] sm:$0xff]  }
  0x35   :  { %1778 = vmatprep.subr.bf16.mxu1 %v1904_v13  ;;  %v81_v36 = vpack.c.bf16 %v72_v33, %v72_v33  ;;  %v80_v39 = vpack.c.bf16 %v71_v38, %v71_v38  ;;  %637 = vmatprep.mubr.bf16.mxu0 %v79_v35  ;;  %v1925_v42 = vld [vmem:[#allocation2 + $0x100] sm:$0xff]   ;;  %v1927_v44 = vld [vmem:[#allocation2 + $0x148] sm:$0xff]   ;;  %v1931_v48 = vld [vmem:[#allocation2 + $0x150] sm:$0xff]  }
  0x36   :  { %v1926_v43 = vld [vmem:[#allocation2 + $0x180] sm:$0xff]   ;;  %v1928_v45 = vld [vmem:[#allocation2 + $0x1c8] sm:$0xff]   ;;  %v1932_v49 = vld [vmem:[#allocation2 + $0x1d0] sm:$0xff]  }
  0x37   :  { %1757 = vmatpush3.bf16.msra.mxu0 %v1905_v14  ;;  %677 = vmatprep.mubr.bf16.mxu1 %v81_v36  ;;  %v1929_v46 = vld [vmem:[#allocation2 + $0x108] sm:$0xff]   ;;  %v1933_v50 = vld [vmem:[#allocation2 + $0x110] sm:$0xff]   ;;  %v1935_v52 = vld [vmem:[#allocation2 + $0x158] sm:$0xff]  }
  0x38   :  { %1779 = vmatpush3.bf16.msra.mxu1 %v1906_v15  ;;  %1758 = vmatprep.subr.bf16.mxu0 %v1907_v16  ;;  %v1930_v47 = vld [vmem:[#allocation2 + $0x188] sm:$0xff]   ;;  %v1934_v51 = vld [vmem:[#allocation2 + $0x190] sm:$0xff]   ;;  %v1936_v53 = vld [vmem:[#allocation2 + $0x1d8] sm:$0xff]  }
  0x39   :  { %1780 = vmatprep.subr.bf16.mxu1 %v1908_v17  ;;  %v1937_v54 = vld [vmem:[#allocation2 + $0x118] sm:$0xff]   ;;  %v1939_v56 = vld [vmem:[#allocation2 + $0x160] sm:$0xff]   ;;  %v1943_v60 = vld [vmem:[#allocation2 + $0x168] sm:$0xff]   ;;  %v2091_v17 = vmov 0.0  }
  0x3a   :  { %v1938_v55 = vld [vmem:[#allocation2 + $0x198] sm:$0xff]   ;;  %v1940_v57 = vld [vmem:[#allocation2 + $0x1e0] sm:$0xff]   ;;  %v1944_v61 = vld [vmem:[#allocation2 + $0x1e8] sm:$0xff]  }
  0x3b   :  { %1759 = vmatpush3.bf16.msra.mxu0 %v1909_v18  ;;  %v1941_v58 = vld [vmem:[#allocation2 + $0x120] sm:$0xff]   ;;  %v1945_v62 = vld [vmem:[#allocation2 + $0x128] sm:$0xff]   ;;  %v1947_v0 = vld [vmem:[#allocation2 + $0x170] sm:$0xff]  }
  0x3c   :  { %1781 = vmatpush3.bf16.msra.mxu1 %v1910_v19  ;;  %1760 = vmatprep.subr.bf16.mxu0 %v1911_v20  ;;  %v1942_v59 = vld [vmem:[#allocation2 + $0x1a0] sm:$0xff]   ;;  %v1946_v63 = vld [vmem:[#allocation2 + $0x1a8] sm:$0xff]   ;;  %v1948_v1 = vld [vmem:[#allocation2 + $0x1f0] sm:$0xff]  }
  0x3d   :  { %1782 = vmatprep.subr.bf16.mxu1 %v1912_v21  ;;  %v1949_v2 = vld [vmem:[#allocation2 + $0x130] sm:$0xff]   ;;  %v1951_v4 = vld [vmem:[#allocation2 + $0x178] sm:$0xff]   ;;  %v74_v8 = vld [vmem:[%s2316_s0 + $0x28] sm:$0xff] }
  0x3e   :  { %v1950_v3 = vld [vmem:[#allocation2 + $0x1b0] sm:$0xff]   ;;  %v1952_v5 = vld [vmem:[#allocation2 + $0x1f8] sm:$0xff]   ;;  %v83_v10 = vpack.c.bf16 %v74_v8, %v74_v8  ;;  %v73_v12 = vld [vmem:[%s2316_s0 + $0x20] sm:$0xff] }
  0x3f   :  { %1761 = vmatpush3.bf16.msra.mxu0 %v1913_v22  ;;  %v1953_v6 = vld [vmem:[#allocation2 + $0x138] sm:$0xff]   ;;  %v75_v13 = vld [vmem:[%s2316_s0 + $0x30] sm:$0xff]  ;;  %v82_v14 = vpack.c.bf16 %v73_v12, %v73_v12  ;;  %v1955_v16 = vld [vmem:[%s2320_s4] sm:$0xff]  }
  0x40   :  { %1783 = vmatpush3.bf16.msra.mxu1 %v1914_v23  ;;  %1762 = vmatprep.subr.bf16.mxu0 %v1915_v24  ;;  %v1954_v7 = vld [vmem:[#allocation2 + $0x1b8] sm:$0xff]   ;;  %v84_v15 = vpack.c.bf16 %v75_v13, %v75_v13  ;;  %v1956_v18 = vld [vmem:[%s2320_s4 + $0x8] sm:$0xff]   ;;  %v1957_v19 = vld [vmem:[%s2320_s4 + $0x10] sm:$0xff]  }
  0x41   :  { %1784 = vmatprep.subr.bf16.mxu1 %v1916_v25  ;;  %v76_v9 = vld [vmem:[%s2316_s0 + $0x38] sm:$0xff]  ;;  %v1959_v21 = vld [vmem:[%s2320_s4 + $0x20] sm:$0xff]   ;;  %v1960_v22 = vld [vmem:[%s2320_s4 + $0x28] sm:$0xff]  }
  0x42   :  { %v85_v11 = vpack.c.bf16 %v76_v9, %v76_v9  ;;  %v1958_v20 = vld [vmem:[%s2320_s4 + $0x18] sm:$0xff]   ;;  %v1961_v23 = vld [vmem:[%s2320_s4 + $0x30] sm:$0xff]   ;;  %v77_v25 = vld [vmem:[%s2317_s1] sm:$0xff] }
  0x43   :  { %1763 = vmatpush3.bf16.msra.mxu0 %v1917_v26  ;;  %v1962_v24 = vld [vmem:[%s2320_s4 + $0x38] sm:$0xff]   ;;  %882 = vrot.lane.b32.xlu0 %v77_v25, %s2090_s22  ;;  %v974_v8 = vld [vmem:[#allocation5 + $0x68] sm:$0xff] }
  0x44   :  { %1785 = vmatpush3.bf16.msra.mxu1 %v1918_v27  ;;  %1764 = vmatprep.subr.bf16.mxu0 %v1919_v28  ;;  %v1608_v28 = vld [vmem:[%s2319_s3] ss:$0 sm:$0xff]  ;;  %v978_v13 = vld [vmem:[#allocation5 + $0x88] sm:$0xff] }
  0x45   :  { %1786 = vmatprep.subr.bf16.mxu1 %v1920_v29 }
  0x47   :  { %1765 = vmatpush3.bf16.msra.mxu0 %v1921_v30 }
  0x48   :  { %1787 = vmatpush3.bf16.msra.mxu1 %v1922_v31  ;;  %1794 = vmatprep.subr.bf16.mxu0 %v1923_v40 }
  0x49   :  { %1816 = vmatprep.subr.bf16.mxu1 %v1924_v41 }
  0x4a   :  { %638 = vmatmul.mubr.bf16.vlgmr.msra.gmra.mrb[0].mxu0 %v78_v37 }
  0x4b   :  { %678 = vmatmul.mubr.bf16.vlgmr.msra.gmra.mrb[0].mxu1 %v80_v39  ;;  %1795 = vmatpush3.bf16.msra.mxu0 %v1925_v42 }
  0x4c   :  { %1817 = vmatpush3.bf16.msra.mxu1 %v1926_v43  ;;  %1796 = vmatprep.subr.bf16.mxu0 %v1927_v44 }
  0x4d   :  { %1818 = vmatprep.subr.bf16.mxu1 %v1928_v45  ;;  %717 = vmatprep.mubr.bf16.mxu0 %v83_v10 }
  0x4e   :  { %757 = vmatprep.mubr.bf16.mxu1 %v85_v11 }
  0x4f   :  { %1797 = vmatpush3.bf16.msra.mxu0 %v1929_v46 }
  0x50   :  { %1819 = vmatpush3.bf16.msra.mxu1 %v1930_v47  ;;  %1798 = vmatprep.subr.bf16.mxu0 %v1931_v48 }
  0x51   :  { %1820 = vmatprep.subr.bf16.mxu1 %v1932_v49 }
  0x53   :  { %1799 = vmatpush3.bf16.msra.mxu0 %v1933_v50 }
  0x54   :  { %1821 = vmatpush3.bf16.msra.mxu1 %v1934_v51  ;;  %1800 = vmatprep.subr.bf16.mxu0 %v1935_v52 }
  0x55   :  { %1822 = vmatprep.subr.bf16.mxu1 %v1936_v53  ;;  %v1963_v53 = vld [vmem:[%s2322_s6] sm:$0xff]  }
  0x57   :  { %1801 = vmatpush3.bf16.msra.mxu0 %v1937_v54  ;;  %v1673_v54 = vld [vmem:[%s2321_s5] ss:$0 sm:$0xff]  ;;  %s2093_s5 = smov 96  }
  0x58   :  { %1823 = vmatpush3.bf16.msra.mxu1 %v1938_v55  ;;  %1802 = vmatprep.subr.bf16.mxu0 %v1939_v56 }
  0x59   :  { %1824 = vmatprep.subr.bf16.mxu1 %v1940_v57 }
  0x5b   :  { %1803 = vmatpush3.bf16.msra.mxu0 %v1941_v58 }
  0x5c   :  { %1825 = vmatpush3.bf16.msra.mxu1 %v1942_v59  ;;  %1804 = vmatprep.subr.bf16.mxu0 %v1943_v60 }
  0x5d   :  { %1826 = vmatprep.subr.bf16.mxu1 %v1944_v61 }
  0x5f   :  { %1805 = vmatpush3.bf16.msra.mxu0 %v1945_v62  ;;  %v1964_v62 = vld [vmem:[%s2322_s6 + $0x8] sm:$0xff]  }
  0x60   :  { %1827 = vmatpush3.bf16.msra.mxu1 %v1946_v63  ;;  %1806 = vmatprep.subr.bf16.mxu0 %v1947_v0  ;;  %v2257_v63 = vld [vmem:[#allocation5] sm:$0xff] }
  0x61   :  { %1828 = vmatprep.subr.bf16.mxu1 %v1948_v1  ;;  %v2259_v0 = vld [vmem:[#allocation5 + $0x20] sm:$0xff]  ;;  %v962_v1 = vld [vmem:[#allocation5 + $0x8] sm:$0xff] }
  0x63   :  { %1807 = vmatpush3.bf16.msra.mxu0 %v1949_v2  ;;  %v1686_v2 = vcombine.low %v2257_v63, %v2259_v0 }
  0x64   :  { %1829 = vmatpush3.bf16.msra.mxu1 %v1950_v3  ;;  %1808 = vmatprep.subr.bf16.mxu0 %v1951_v4  ;;  %v1687_v3 = vcombine.high %v2257_v63, %v2259_v0  ;;  %v966_v4 = vld [vmem:[#allocation5 + $0x28] sm:$0xff]  ;;  %v1021_v63 = vld [vmem:[#allocation5 + $0x1e0] sm:$0xff] }
  0x65   :  { %1830 = vmatprep.subr.bf16.mxu1 %v1952_v5  ;;  %v1688_v5 = vcombine.low %v962_v1, %v966_v4  ;;  %v1018_v0 = vld [vmem:[#allocation5 + $0x1c8] sm:$0xff] }
  0x67   :  { %1809 = vmatpush3.bf16.msra.mxu0 %v1953_v6  ;;  %v1689_v6 = vcombine.high %v962_v1, %v966_v4 }
  0x68   :  { %1831 = vmatpush3.bf16.msra.mxu1 %v1954_v7  ;;  %1850 = vmatprep.subr.bf16.mxu0 %v2091_v17  ;;  %v970_v7 = vld [vmem:[#allocation5 + $0x48] sm:$0xff] }
  0x69   :  { %1870 = vmatprep.subr.bf16.mxu1 %v2091_v17  ;;  %v1697_v9 = vcombine.high %v970_v7, %v974_v8  ;;  %v1696_v11 = vcombine.low %v970_v7, %v974_v8  ;;  %v967_v7 = vld [vmem:[#allocation5 + $0x30] sm:$0xff]  ;;  %v964_v8 = vld [vmem:[#allocation5 + $0x18] sm:$0xff] }
  0x6a   :  { %718 = vmatmul.mubr.bf16.vlgmr.msra.gmra.mrb[4].mxu0 %v82_v14  ;;  %v982_v14 = vld [vmem:[#allocation5 + $0xa8] sm:$0xff] }
  0x6b   :  { %758 = vmatmul.mubr.bf16.vlgmr.msra.gmra.mrb[4].mxu1 %v84_v15  ;;  %1851 = vmatpush3.bf16.msra.mxu0 %v1955_v16  ;;  %v1705_v16 = vcombine.high %v978_v13, %v982_v14 }
  0x6c   :  { %1852 = vmatprep.subr.bf16.mxu0 %v2091_v17  ;;  %1866 = vmatprep.mubr.msk.bf16.mxu0 %vm2092_vm0, %v2091_v17 }
  0x6d   :  { %1874 = vmatprep.mubr.msk.bf16.mxu1 %vm2092_vm0, %v2091_v17  ;;  %1871 = vmatpush3.bf16.msra.mxu1 %v1963_v53  ;;  %v1001_v53 = vld [vmem:[#allocation5 + $0x140] sm:$0xff] }
  0x6e   :  { %1872 = vmatprep.subr.bf16.mxu1 %v2091_v17 }
  0x6f   :  { %1853 = vmatpush3.bf16.msra.mxu0 %v1956_v18  ;;  %v986_v18 = vld [vmem:[#allocation5 + $0xc8] sm:$0xff] }
  0x70   :  { %1854 = vmatprep.subr.bf16.mxu0 %v2091_v17 }
  0x71   :  { %1873 = vmatpush3.bf16.msra.mxu1 %v1964_v62  ;;  %v1017_v62 = vld [vmem:[#allocation5 + $0x1c0] sm:$0xff] }
  0x72   :  { %1387 = vmatprep.subr.bf16.mxu1 %v1687_v3  ;;  %v1743_v1 = vcombine.high %v1017_v62, %v1021_v63  ;;  %v1742_v3 = vcombine.low %v1017_v62, %v1021_v63  ;;  %v1015_v62 = vld [vmem:[#allocation5 + $0x1b0] sm:$0xff]  ;;  %v1012_v63 = vld [vmem:[#allocation5 + $0x198] sm:$0xff] }
  0x73   :  { %1855 = vmatpush3.bf16.msra.mxu0 %v1957_v19  ;;  %v990_v19 = vld [vmem:[#allocation5 + $0xe8] sm:$0xff] }
  0x74   :  { %1856 = vmatprep.subr.bf16.mxu0 %v2091_v17 }
  0x77   :  { %1857 = vmatpush3.bf16.msra.mxu0 %v1958_v20  ;;  %v1713_v20 = vcombine.high %v986_v18, %v990_v19 }
  0x78   :  { %1858 = vmatprep.subr.bf16.mxu0 %v2091_v17 }
  0x7b   :  { %1859 = vmatpush3.bf16.msra.mxu0 %v1959_v21  ;;  %v1712_v21 = vcombine.low %v986_v18, %v990_v19  ;;  %v971_v19 = vld [vmem:[#allocation5 + $0x50] sm:$0xff] }
  0x7c   :  { %1860 = vmatprep.subr.bf16.mxu0 %v2091_v17 }
  0x7f   :  { %1861 = vmatpush3.bf16.msra.mxu0 %v1960_v22  ;;  %v994_v22 = vld [vmem:[#allocation5 + $0x108] sm:$0xff] }
  0x80   :  { %1862 = vmatprep.subr.bf16.mxu0 %v2091_v17 }
  0x83   :  { %1863 = vmatpush3.bf16.msra.mxu0 %v1961_v23  ;;  %v998_v23 = vld [vmem:[#allocation5 + $0x128] sm:$0xff] }
  0x84   :  { %1864 = vmatprep.subr.bf16.mxu0 %v2091_v17  ;;  %v1704_v17 = vcombine.low %v978_v13, %v982_v14  ;;  %v1720_v25 = vcombine.low %v994_v22, %v998_v23 }
  0x87   :  { %1865 = vmatpush3.bf16.msra.mxu0 %v1962_v24  ;;  %v1721_v24 = vcombine.high %v994_v22, %v998_v23  ;;  %v972_v22 = vld [vmem:[#allocation5 + $0x58] sm:$0xff] }
  0x88   :  { %1428 = vmatprep.subr.bf16.mxu0 %v1689_v6  ;;  %v963_v6 = vld [vmem:[#allocation5 + $0x10] sm:$0xff]  ;;  %v976_v23 = vld [vmem:[#allocation5 + $0x78] sm:$0xff] }
  0xb5   :  { %v883_v10 = vpop.permute.xlu0 %882 }
 0x11d   :  { %v1766_v26 = vpop.f32.mrb[0].mxu0 }
 0x11e   :  { %v1788_v27 = vpop.f32.mrb[0].mxu1  ;;  %v1767_v29 = vpop.f32.mrb[1].mxu0 }
 0x11f   :  { %v1789_v30 = vpop.f32.mrb[1].mxu1  ;;  %v1768_v31 = vadd.f32 %v1767_v29, %v1766_v26  ;;  %v1769_v33 = vpop.f32.mrb[2].mxu0  ;;  %v1002_v26 = vld [vmem:[#allocation5 + $0x148] sm:$0xff] }
 0x120   :  { %v1790_v32 = vadd.f32 %v1789_v30, %v1788_v27  ;;  %v1791_v34 = vpop.f32.mrb[2].mxu1  ;;  %v1770_v35 = vpop.f32.mrb[3].mxu0  ;;  %v1006_v27 = vld [vmem:[#allocation5 + $0x168] sm:$0xff] }
 0x121   :  { %v1792_v36 = vpop.f32.mrb[3].mxu1  ;;  %v640_v37 = vadd.f32 %v1768_v31, %v1608_v28  ;;  %v1729_v28 = vcombine.high %v1002_v26, %v1006_v27  ;;  %v1728_v29 = vcombine.low %v1002_v26, %v1006_v27  ;;  %v1010_v30 = vld [vmem:[#allocation5 + $0x188] sm:$0xff] }
 0x122   :  { %v1014_v31 = vld [vmem:[#allocation5 + $0x1a8] sm:$0xff]  ;;  %v969_v36 = vld [vmem:[#allocation5 + $0x40] sm:$0xff] }
 0x123   :  { %v680_v38 = vadd.f32 %v1790_v32, %v640_v37  ;;  %v1737_v32 = vcombine.high %v1010_v30, %v1014_v31  ;;  %v1736_v33 = vcombine.low %v1010_v30, %v1014_v31  ;;  %v973_v37 = vld [vmem:[#allocation5 + $0x60] sm:$0xff]  ;;  %v983_v30 = vld [vmem:[#allocation5 + $0xb0] sm:$0xff]  ;;  %v980_v31 = vld [vmem:[#allocation5 + $0x98] sm:$0xff] }
 0x13d   :  { %v1810_v39 = vpop.f32.mrb[4].mxu0 }
 0x13e   :  { %v1832_v40 = vpop.f32.mrb[4].mxu1  ;;  %v1811_v41 = vpop.f32.mrb[5].mxu0 }
 0x13f   :  { %v1812_v42 = vadd.f32 %v1811_v41, %v1810_v39  ;;  %v1833_v43 = vpop.f32.mrb[5].mxu1  ;;  %v1813_v44 = vpop.f32.mrb[6].mxu0  ;;  %v977_v41 = vld [vmem:[#allocation5 + $0x80] sm:$0xff] }
 0x140   :  { %v1834_v45 = vadd.f32 %v1833_v43, %v1832_v40  ;;  %v1835_v46 = vpop.f32.mrb[6].mxu1  ;;  %v1814_v47 = vpop.f32.mrb[7].mxu0  ;;  %v1695_v40 = vcombine.high %v969_v36, %v973_v37  ;;  %v1694_v43 = vcombine.low %v969_v36, %v973_v37  ;;  %v987_v37 = vld [vmem:[#allocation5 + $0xd0] sm:$0xff] }
 0x141   :  { %v720_v48 = vadd.f32 %v1812_v42, %v680_v38  ;;  %v1836_v49 = vpop.f32.mrb[7].mxu1  ;;  %v981_v42 = vld [vmem:[#allocation5 + $0xa0] sm:$0xff] }
 0x142   :  { %v1703_v44 = vcombine.high %v977_v41, %v981_v42  ;;  %v989_v46 = vld [vmem:[#allocation5 + $0xe0] sm:$0xff]  ;;  %v1702_v47 = vcombine.low %v977_v41, %v981_v42 }
 0x143   :  { %v760_v50 = vadd.f32 %v1834_v45, %v720_v48  ;;  %v985_v45 = vld [vmem:[#allocation5 + $0xc0] sm:$0xff] }
 0x144   :  { %v1711_v48 = vcombine.high %v985_v45, %v989_v46  ;;  %v993_v49 = vld [vmem:[#allocation5 + $0x100] sm:$0xff] }
 0x145   :  { %v765_v51 = vmax.f32 %v760_v50, 0.0  ;;  %v997_v50 = vld [vmem:[#allocation5 + $0x120] sm:$0xff] }
 0x147   :  { %v766_v52 = vpack.c.bf16 %v765_v51, %v765_v51  ;;  %v1710_v51 = vcombine.low %v985_v45, %v989_v46  ;;  %v995_v45 = vld [vmem:[#allocation5 + $0x110] sm:$0xff] }
 0x148   :  { %v999_v46 = vld [vmem:[#allocation5 + $0x130] sm:$0xff] }
 0x149   :  { %1867 = vmatmul.mubr.bf16.vlgmr.msra.gmra.mrb[8].mxu0 %v766_v52  ;;  %v1719_v52 = vcombine.high %v993_v49, %v997_v50 }
 0x14a   :  { %1429 = vmatpush1.bf16.msra.mxu0 %v1688_v5 }
 0x14b   :  { %1430 = vmatprep.subr.bf16.mxu0 %v1697_v9  ;;  %v1690_v9 = vcombine.low %v963_v6, %v967_v7 }
 0x14e   :  { %1431 = vmatpush1.bf16.msra.mxu0 %v1696_v11  ;;  %v968_v11 = vld [vmem:[#allocation5 + $0x38] sm:$0xff] }
 0x14f   :  { %1432 = vmatprep.subr.bf16.mxu0 %v1705_v16  ;;  %v1692_v13 = vcombine.low %v964_v8, %v968_v11  ;;  %v1693_v14 = vcombine.high %v964_v8, %v968_v11  ;;  %v1024_v8 = vld [vmem:[#allocation5 + $0x1f8] sm:$0xff] }
 0x152   :  { %1433 = vmatpush1.bf16.msra.mxu0 %v1704_v17 }
 0x153   :  { %1434 = vmatprep.subr.bf16.mxu0 %v1713_v20 }
 0x156   :  { %1435 = vmatpush1.bf16.msra.mxu0 %v1712_v21  ;;  %v975_v21 = vld [vmem:[#allocation5 + $0x70] sm:$0xff] }
 0x157   :  { %1436 = vmatprep.subr.bf16.mxu0 %v1721_v24  ;;  %v1699_v27 = vcombine.high %v971_v19, %v975_v21 }
 0x15a   :  { %1437 = vmatpush1.bf16.msra.mxu0 %v1720_v25 }
 0x15b   :  { %1438 = vmatprep.subr.bf16.mxu0 %v1729_v28  ;;  %v1701_v28 = vcombine.high %v972_v22, %v976_v23 }
 0x15e   :  { %1439 = vmatpush1.bf16.msra.mxu0 %v1728_v29  ;;  %v979_v29 = vld [vmem:[#allocation5 + $0x90] sm:$0xff] }
 0x15f   :  { %1440 = vmatprep.subr.bf16.mxu0 %v1737_v32  ;;  %v984_v32 = vld [vmem:[#allocation5 + $0xb8] sm:$0xff]  ;;  %v1706_v41 = vcombine.low %v979_v29, %v983_v30 }
 0x160   :  { %v1709_v36 = vcombine.high %v980_v31, %v984_v32  ;;  %v1708_v42 = vcombine.low %v980_v31, %v984_v32 }
 0x162   :  { %1441 = vmatpush1.bf16.msra.mxu0 %v1736_v33  ;;  %v1698_v33 = vcombine.low %v971_v19, %v975_v21 }
 0x21c   :  { %v872_v55 = vpop.f32.mrb[8].mxu0 }
 0x21d   :  { %v2249_v56 = vadd.f32 %v1673_v54, %v872_v55  ;;  %v1868_v57 = vpop.f32.mrb[9].mxu0  ;;  %v1005_v54 = vld [vmem:[#allocation5 + $0x160] sm:$0xff]  ;;  %v1718_v55 = vcombine.low %v993_v49, %v997_v50 }
 0x21e   :  { %v875_v58 = vpop.f32.mrb[10].mxu0  ;;  %v1009_v57 = vld [vmem:[#allocation5 + $0x180] sm:$0xff] }
 0x21f   :  { %v878_v59 = vmul.f32 0.5, %v2249_v56  ;;  %v1869_v60 = vpop.f32.mrb[11].mxu0  ;;  %1559 = vst.msk [vmem:[#allocation8] sm:$0xff] %vm915_vm1, %v2249_v56  ;;  %v1013_v58 = vld [vmem:[#allocation5 + $0x1a0] sm:$0xff] }
 0x220   :  { %v1735_v60 = vcombine.high %v1009_v57, %v1013_v58 }
 0x221   :  { %v879_v61 = vmul.f32 1.442695, %v878_v59  ;;  %v1726_v59 = vcombine.low %v1001_v53, %v1005_v54 }
 0x223   :  { %1965 = vpow2.f32 %v879_v61  ;;  %v1734_v61 = vcombine.low %v1009_v57, %v1013_v58  ;;  %v1722_v57 = vcombine.low %v995_v45, %v999_v46 }
 0x22d   :  { %v1966_v12 = vpop.eup %1965 }
 0x22e   :  { %v885_v15 = vmul.f32 %v1966_v12, %v883_v10  ;;  %1561 = vrot.lane.b32.xlu1 %v1966_v12, %s2093_s5  ;;  %v1691_v10 = vcombine.high %v963_v6, %v967_v7  ;;  %v2094_v12 = vmov 0   ;;  %v1023_v6 = vld [vmem:[#allocation5 + $0x1f0] sm:$0xff]  ;;  %v1020_v7 = vld [vmem:[#allocation5 + $0x1d8] sm:$0xff] }
 0x22f   :  { %1460 = vmatprep.mubr.bf16.mxu0 %v2094_v12 }
 0x230   :  { %887 = vrot.lane.b32.xlu0 %v885_v15, %s2093_s5  ;;  %v1682_v15 = vld [vmem:[%s2323_s7] ss:$0 sm:$0xff]  ;;  %s2095_s7 = smov [#allocation8]  }
 0x231   :  { %s1581_s8 = sshll.u32 %s2095_s7, 4  ;;  %s1582_s8 = int_to_ptr.vmem [resolvable:$true] %s1581_s8 }
 0x232   :  { %s2011_s0 = scalar_lea.vmem %s1582_s8, 128  ;;  %p2016_p3 = scmp.lt.s32.totalorder %s1582_s8, %s1582_s8 }
 0x233   :  { %p2012_p2 = scmp.ne.s32.totalorder %s1582_s8, %s2011_s0  ;;  %p2017_p4 = scmp.lt.s32.totalorder %s2011_s0, %s2011_s0 }
 0x235   :  { %p2018_p5 = por %p2017_p4, %p2016_p3 }
 0x237   :  { %p2019_p6 = pnand %p2018_p5, %p2012_p2 }
 0x2a0   :  { %v1562_v34 = vpop.permute.xlu1 %1561 }
 0x2a1   :  { %1564 = vst.msk [vmem:[#allocation10] sm:$0xff] %vm915_vm1, %v1562_v34  ;;  %v1700_v34 = vcombine.low %v972_v22, %v976_v23 }
 0x2a2   :  { %v888_v35 = vpop.permute.xlu0 %887 }
 0x2a3   :  { %v890_v38 = vadd.f32 %v888_v35, %v2249_v56  ;;  %v1727_v56 = vcombine.high %v1001_v53, %v1005_v54  ;;  %v1707_v35 = vcombine.high %v979_v29, %v983_v30  ;;  %v1003_v53 = vld [vmem:[#allocation5 + $0x150] sm:$0xff] }
 0x2a4   :  { %v1007_v54 = vld [vmem:[#allocation5 + $0x170] sm:$0xff] }
 0x2a5   :  { %v891_v39 = vpack.c.bf16 %v890_v38, %v890_v38  ;;  %v991_v38 = vld [vmem:[#allocation5 + $0xf0] sm:$0xff] }
 0x2a6   :  { %v1714_v49 = vcombine.low %v987_v37, %v991_v38 }
 0x2a7   :  { %1875 = vmatmul.mubr.msk.bf16.vlgmr.msra.gmra.mrb[8].mxu1 %vm915_vm1, %v891_v39  ;;  %v988_v39 = vld [vmem:[#allocation5 + $0xd8] sm:$0xff] }
 0x2a8   :  { %1388 = vmatpush1.bf16.msra.mxu1 %v1686_v2  ;;  %v1022_v2 = vld [vmem:[#allocation5 + $0x1e8] sm:$0xff]  ;;  %1419 = vmatprep.mubr.bf16.mxu1 %v2094_v12 }
 0x2a9   :  { %1389 = vmatprep.subr.bf16.mxu1 %v1695_v40  ;;  %v1744_v4 = vcombine.low %v1018_v0, %v1022_v2  ;;  %v1745_v5 = vcombine.high %v1018_v0, %v1022_v2  ;;  %v992_v40 = vld [vmem:[#allocation5 + $0xf8] sm:$0xff] }
 0x2aa   :  { %v1716_v50 = vcombine.low %v988_v39, %v992_v40  ;;  %v1016_v0 = vld [vmem:[#allocation5 + $0x1b8] sm:$0xff] }
 0x2ab   :  { %1442 = vmatprep.subr.bf16.mxu0 %v1745_v5  ;;  %v1019_v5 = vld [vmem:[#allocation5 + $0x1d0] sm:$0xff] }
 0x2ac   :  { %1390 = vmatpush1.bf16.msra.mxu1 %v1694_v43  ;;  %1443 = vmatpush1.bf16.msra.mxu0 %v1744_v4  ;;  %v1715_v43 = vcombine.high %v987_v37, %v991_v38  ;;  %v1741_v4 = vcombine.high %v1012_v63, %v1016_v0  ;;  %v1747_v11 = vcombine.high %v1019_v5, %v1023_v6 }
 0x2ad   :  { %1391 = vmatprep.subr.bf16.mxu1 %v1703_v44  ;;  %1510 = vmatprep.subr.bf16.mxu0 %v1693_v14  ;;  %v1717_v44 = vcombine.high %v988_v39, %v992_v40  ;;  %v1748_v14 = vcombine.low %v1020_v7, %v1024_v8 }
 0x2b0   :  { %1392 = vmatpush1.bf16.msra.mxu1 %v1702_v47  ;;  %v996_v47 = vld [vmem:[#allocation5 + $0x118] sm:$0xff] }
 0x2b1   :  { %1393 = vmatprep.subr.bf16.mxu1 %v1711_v48  ;;  %v1000_v48 = vld [vmem:[#allocation5 + $0x138] sm:$0xff] }
 0x2b2   :  { %v1724_v58 = vcombine.low %v996_v47, %v1000_v48 }
 0x2b4   :  { %1394 = vmatpush1.bf16.msra.mxu1 %v1710_v51  ;;  %v1723_v51 = vcombine.high %v995_v45, %v999_v46 }
 0x2b5   :  { %1395 = vmatprep.subr.bf16.mxu1 %v1719_v52  ;;  %v1725_v52 = vcombine.high %v996_v47, %v1000_v48 }
 0x2b8   :  { %1396 = vmatpush1.bf16.msra.mxu1 %v1718_v55  ;;  %v1004_v55 = vld [vmem:[#allocation5 + $0x158] sm:$0xff] }
 0x2b9   :  { %1397 = vmatprep.subr.bf16.mxu1 %v1727_v56  ;;  %v1008_v56 = vld [vmem:[#allocation5 + $0x178] sm:$0xff] }
 0x2ba   :  { %v1732_v2 = vcombine.low %v1004_v55, %v1008_v56 }
 0x2bc   :  { %1398 = vmatpush1.bf16.msra.mxu1 %v1726_v59  ;;  %v1731_v59 = vcombine.high %v1003_v53, %v1007_v54 }
 0x2bd   :  { %1399 = vmatprep.subr.bf16.mxu1 %v1735_v60  ;;  %v1733_v60 = vcombine.high %v1004_v55, %v1008_v56 }
 0x2c0   :  { %1400 = vmatpush1.bf16.msra.mxu1 %v1734_v61  ;;  %v1011_v61 = vld [vmem:[#allocation5 + $0x190] sm:$0xff] }
 0x2c1   :  { %1401 = vmatprep.subr.bf16.mxu1 %v1743_v1  ;;  %v1730_v1 = vcombine.low %v1003_v53, %v1007_v54 }
 0x2c4   :  { %1402 = vmatpush1.bf16.msra.mxu1 %v1742_v3  ;;  %v1739_v3 = vcombine.high %v1011_v61, %v1015_v62 }
 0x2c5   :  { %1469 = vmatprep.subr.bf16.mxu1 %v1691_v10  ;;  %v1740_v10 = vcombine.low %v1012_v63, %v1016_v0 }
 0x37a   :  { %v953_v16 = vpop.f32.mrb[8].mxu1 }
 0x37b   :  { %v954_v17 = vadd.f32 %v1682_v15, %v953_v16  ;;  %v1876_v18 = vpop.f32.mrb[9].mxu1 }
 0x37c   :  { %v956_v20 = vpop.f32.mrb[10].mxu1 }
 0x37d   :  { %v959_v24 = vmax.f32 %v954_v17, 0.0  ;;  %v1877_v25 = vpop.f32.mrb[11].mxu1 }
 0x37f   :  { %v2271_v26 = vpack.c.bf16 %v959_v24, %v959_v24 }
 0x381   :  { %1420 = vmatmul.mubr.bf16.vlgmr.msra.gmra.mrb[12].mxu1 %v2271_v26  ;;  %1461 = vmatmul.mubr.bf16.vlgmr.msra.gmra.mrb[12].mxu0 %v2271_v26 }
 0x382   :  { %1470 = vmatpush1.bf16.msra.mxu1 %v1690_v9  ;;  %1511 = vmatpush1.bf16.msra.mxu0 %v1692_v13  ;;  %v1738_v9 = vcombine.low %v1011_v61, %v1015_v62  ;;  %v1746_v13 = vcombine.low %v1019_v5, %v1023_v6 }
 0x383   :  { %1471 = vmatprep.subr.bf16.mxu1 %v1699_v27  ;;  %1512 = vmatprep.subr.bf16.mxu0 %v1701_v28 }
 0x384   :  { %1501 = vmatprep.mubr.bf16.mxu1 %v2094_v12  ;;  %1542 = vmatprep.mubr.bf16.mxu0 %v2094_v12  ;;  %v1749_v12 = vcombine.high %v1020_v7, %v1024_v8 }
 0x386   :  { %1472 = vmatpush1.bf16.msra.mxu1 %v1698_v33  ;;  %1513 = vmatpush1.bf16.msra.mxu0 %v1700_v34 }
 0x387   :  { %1473 = vmatprep.subr.bf16.mxu1 %v1707_v35  ;;  %1514 = vmatprep.subr.bf16.mxu0 %v1709_v36 }
 0x38a   :  { %1474 = vmatpush1.bf16.msra.mxu1 %v1706_v41  ;;  %1515 = vmatpush1.bf16.msra.mxu0 %v1708_v42 }
 0x38b   :  { %1475 = vmatprep.subr.bf16.mxu1 %v1715_v43  ;;  %1516 = vmatprep.subr.bf16.mxu0 %v1717_v44 }
 0x38e   :  { %1476 = vmatpush1.bf16.msra.mxu1 %v1714_v49  ;;  %1517 = vmatpush1.bf16.msra.mxu0 %v1716_v50 }
 0x38f   :  { %1477 = vmatprep.subr.bf16.mxu1 %v1723_v51  ;;  %1518 = vmatprep.subr.bf16.mxu0 %v1725_v52 }
 0x392   :  { %1478 = vmatpush1.bf16.msra.mxu1 %v1722_v57  ;;  %1519 = vmatpush1.bf16.msra.mxu0 %v1724_v58 }
 0x393   :  { %1479 = vmatprep.subr.bf16.mxu1 %v1731_v59  ;;  %1520 = vmatprep.subr.bf16.mxu0 %v1733_v60 }
 0x396   :  { %1480 = vmatpush1.bf16.msra.mxu1 %v1730_v1  ;;  %1521 = vmatpush1.bf16.msra.mxu0 %v1732_v2 }
 0x397   :  { %1481 = vmatprep.subr.bf16.mxu1 %v1739_v3  ;;  %1522 = vmatprep.subr.bf16.mxu0 %v1741_v4 }
 0x39a   :  { %1482 = vmatpush1.bf16.msra.mxu1 %v1738_v9  ;;  %1523 = vmatpush1.bf16.msra.mxu0 %v1740_v10 }
 0x39b   :  { %1483 = vmatprep.subr.bf16.mxu1 %v1747_v11  ;;  %1524 = vmatprep.subr.bf16.mxu0 %v1749_v12 }
 0x39e   :  { %1484 = vmatpush1.bf16.msra.mxu1 %v1746_v13  ;;  %1525 = vmatpush1.bf16.msra.mxu0 %v1748_v14 }
 0x3a1   :  { %1502 = vmatmul.mubr.bf16.vlgmr.msra.gmra.mrb[16].mxu1 %v2271_v26  ;;  %1543 = vmatmul.mubr.bf16.vlgmr.msra.gmra.mrb[16].mxu0 %v2271_v26 }
 0x3a2   :  { %2022 = shalt.err (!%p2019_p6)
}
 0x3a3   :  { %s2023_s14 = scalar_lea.hbm %s2327_s11, 128 }
 0x3a4   :  { %p2024_p7 = scmp.ne.s32.totalorder %s2327_s11, %s2023_s14  ;;  %p2027_p8 = scmp.lt.u32.totalorder %s2023_s14, %s2327_s11 }
 0x3a6   :  { %p2029_p9 = pnand %p2027_p8, %p2024_p7 }
 0x3a8   :  { %2032 = shalt.err (!%p2029_p9)
}
 0x3a9   :  { %1584 = dma.vmem_to_hbm [thread:$0]  %s1582_s8, 128, %s2327_s11, [#allocation9]  }
 0x3aa   :  { %s2096_s21 = smov [#allocation10]  }
 0x3ab   :  { %s1591_s23 = sshll.u32 %s2096_s21, 4  ;;  %s1592_s23 = int_to_ptr.vmem [resolvable:$true] %s1591_s23 }
 0x3ac   :  { %s2033_s24 = scalar_lea.vmem %s1592_s23, 128  ;;  %p2038_p11 = scmp.lt.s32.totalorder %s1592_s23, %s1592_s23 }
 0x3ad   :  { %p2034_p10 = scmp.ne.s32.totalorder %s1592_s23, %s2033_s24  ;;  %p2039_p12 = scmp.lt.s32.totalorder %s2033_s24, %s2033_s24 }
 0x3af   :  { %p2040_p13 = por %p2039_p12, %p2038_p11 }
 0x3b1   :  { %p2041_p0 = pnand %p2040_p13, %p2034_p10 }
 0x3b3   :  { %2044 = shalt.err (!%p2041_p0)
}
 0x3b4   :  { %s2045_s27 = scalar_lea.hbm %s2328_s12, 128 }
 0x3b5   :  { %p2046_p1 = scmp.ne.s32.totalorder %s2328_s12, %s2045_s27  ;;  %p2049_p2 = scmp.lt.u32.totalorder %s2045_s27, %s2328_s12 }
 0x3b7   :  { %p2051_p3 = pnand %p2049_p2, %p2046_p1 }
 0x3b9   :  { %2054 = shalt.err (!%p2051_p3)
}
 0x3ba   :  { %1594 = dma.vmem_to_hbm [thread:$0]  %s1592_s23, 128, %s2328_s12, [#allocation9]   ;;  %v1027_v15 = vlaneseq  ;;  %v1025_v19 = vld [vmem:[%s2325_s9] sm:$0xff] }
 0x3bb   :  { %s2097_s9 = smov [#allocation7]  }
 0x3bc   :  { %v1028_v16 = vshrl.u32 %v1027_v15, 7  ;;  %s1571_s12 = sshll.u32 %s2097_s9, 4  ;;  %s1572_s12 = int_to_ptr.vmem [resolvable:$true] %s1571_s12 }
 0x3bd   :  { %s2055_s6 = scalar_lea.vmem %s1572_s12, 1024  ;;  %p2060_p5 = scmp.lt.s32.totalorder %s1572_s12, %s1572_s12 }
 0x3be   :  { %v1029_v17 = vsub.s32 0, %v1028_v16  ;;  %v1037_v18 = vsub.s32 2, %v1028_v16  ;;  %v1033_v20 = vsub.s32 1, %v1028_v16  ;;  %v1041_v21 = vsub.s32 3, %v1028_v16  ;;  %p2056_p4 = scmp.ne.s32.totalorder %s1572_s12, %s2055_s6  ;;  %p2061_p6 = scmp.lt.s32.totalorder %s2055_s6, %s2055_s6 }
 0x3bf   :  { %v1045_v38 = vsub.s32 4, %v1028_v16  ;;  %v1053_v39 = vsub.s32 6, %v1028_v16  ;;  %v1049_v40 = vsub.s32 5, %v1028_v16  ;;  %v1057_v41 = vsub.s32 7, %v1028_v16 }
 0x3c0   :  { %v1030_v22 = vrot.slane %v1025_v19, %v1029_v17  ;;  %v1038_v23 = vrot.slane %v1025_v19, %v1037_v18  ;;  %v1034_v24 = vrot.slane %v1025_v19, %v1033_v20  ;;  %v1042_v25 = vrot.slane %v1025_v19, %v1041_v21  ;;  %p2062_p7 = por %p2061_p6, %p2060_p5 }
 0x3c1   :  { %v1046_v42 = vrot.slane %v1025_v19, %v1045_v38  ;;  %v1054_v43 = vrot.slane %v1025_v19, %v1053_v39  ;;  %v1050_v44 = vrot.slane %v1025_v19, %v1049_v40  ;;  %v1058_v45 = vrot.slane %v1025_v19, %v1057_v41 }
 0x3c2   :  { %p2063_p8 = pnand %p2062_p7, %p2056_p4 }
 0x454   :  { %v1421_v26 = vpop.f32.mrb[12].mxu1  ;;  %v1462_v27 = vpop.f32.mrb[12].mxu0 }
 0x455   :  { %v1422_v28 = vadd.f32 %v1421_v26, %v1030_v22  ;;  %v1463_v29 = vadd.f32 %v1462_v27, %v1038_v23  ;;  %v1423_v30 = vpop.f32.mrb[13].mxu1  ;;  %v1464_v31 = vpop.f32.mrb[13].mxu0 }
 0x456   :  { %v1424_v32 = vadd.f32 %v1423_v30, %v1034_v24  ;;  %v1465_v33 = vadd.f32 %v1464_v31, %v1042_v25  ;;  %v1425_v34 = vpop.f32.mrb[14].mxu1  ;;  %v1466_v35 = vpop.f32.mrb[14].mxu0 }
 0x457   :  { %1551 = vst [vmem:[#allocation7] sm:$0xff] %v1422_v28  ;;  %1553 = vst [vmem:[#allocation7 + $0x10] sm:$0xff] %v1463_v29  ;;  %v1426_v36 = vpop.f32.mrb[15].mxu1  ;;  %v1467_v37 = vpop.f32.mrb[15].mxu0 }
 0x458   :  { %1552 = vst [vmem:[#allocation7 + $0x8] sm:$0xff] %v1424_v32  ;;  %1554 = vst [vmem:[#allocation7 + $0x18] sm:$0xff] %v1465_v33 }
 0x474   :  { %v1503_v46 = vpop.f32.mrb[16].mxu1  ;;  %v1544_v47 = vpop.f32.mrb[16].mxu0 }
 0x475   :  { %v1504_v48 = vadd.f32 %v1503_v46, %v1046_v42  ;;  %v1545_v49 = vadd.f32 %v1544_v47, %v1054_v43  ;;  %v1505_v50 = vpop.f32.mrb[17].mxu1  ;;  %v1546_v51 = vpop.f32.mrb[17].mxu0 }
 0x476   :  { %v1506_v52 = vadd.f32 %v1505_v50, %v1050_v44  ;;  %v1547_v53 = vadd.f32 %v1546_v51, %v1058_v45  ;;  %v1507_v54 = vpop.f32.mrb[18].mxu1  ;;  %v1548_v55 = vpop.f32.mrb[18].mxu0 }
 0x477   :  { %1555 = vst [vmem:[#allocation7 + $0x20] sm:$0xff] %v1504_v48  ;;  %1557 = vst [vmem:[#allocation7 + $0x30] sm:$0xff] %v1545_v49  ;;  %v1508_v56 = vpop.f32.mrb[19].mxu1  ;;  %v1549_v57 = vpop.f32.mrb[19].mxu0 }
 0x478   :  { %1556 = vst [vmem:[#allocation7 + $0x28] sm:$0xff] %v1506_v52  ;;  %1558 = vst [vmem:[#allocation7 + $0x38] sm:$0xff] %v1547_v53 }
 0x479   :  { %2066 = shalt.err (!%p2063_p8)
}
 0x47a   :  { %s2067_s8 = scalar_lea.hbm %s2326_s10, 1024 }
 0x47b   :  { %p2068_p9 = scmp.ne.s32.totalorder %s2326_s10, %s2067_s8  ;;  %p2071_p10 = scmp.lt.u32.totalorder %s2067_s8, %s2326_s10 }
 0x47d   :  { %p2073_p11 = pnand %p2071_p10, %p2068_p9 }
 0x47f   :  { %2076 = shalt.err (!%p2073_p11)
}
 0x480   :  { %1574 = dma.vmem_to_hbm [thread:$0]  %s1572_s12, 1024, %s2326_s10, [#allocation4]  }
 0x481   :  { %2081 = dma.done.wait [#allocation4], 1024  }
 0x482   :  { %2082 = vsyncadd [#allocation4], 4294966272 }
 0x483   :  { %2083 = dma.done.wait [#allocation9], 256  }
 0x484   :  { %2084 = vsyncadd [#allocation9], 4294967040 }
 0x485   :  { %1604 = vsyncpa [#allocation3], 1 }
 0x486   :  { %1605 = vsyncpa [#allocation6], 1 }
 0x487   :  { %1606 = vsyncpa [#allocation4], 1 }
 0x488   :  { %1607 = vsyncpa [#allocation9], 1 }

</bundles_post_ra>
